<compile_context>
chip_gen: v7x
topology: tpu7x:2x2x1
jax: 0.10.0
libtpu: 0.0.40
codegen_flags: <defaults>
</compile_context>

<pallas_src>
import jax
import jax.numpy as jnp
from jax.experimental import pallas as pl
from jax.experimental.pallas import tpu as pltpu


# Packed parameter slab layout, shape (10, 16) float32:
#   col 0      : l1.weight (10,1) column
#   col 1      : l1.bias   (10,)
#   cols 2..11 : l2.weight (10,10); P[g, 2+f] = W2[g, f]
#   col 12     : l2.bias   (10,)
#   col 13     : l3.weight (1,10) stored as a column
#   P[0, 14]   : l3.bias   scalar
_P_ROWS, _P_COLS = 10, 16


def net2_kernel(p_ref, x_ref, o_ref):
    p = p_ref[...]                     # (10, 16)  resident packed params (vreg-sized)
    x = x_ref[...]                     # (1, tile) batch on the lane axis

    w1 = p[:, 0:1]                     # (10, 1)
    b1 = p[:, 1:2]                     # (10, 1)
    b2 = p[:, 12:13]                   # (10, 1)
    w3 = p[:, 13:14]                   # (10, 1)
    b3 = p[0:1, 14:15]                 # (1, 1)

    # l1: (N,1) @ (1,10) is an outer product -> single broadcast multiply-add on the VPU.
    h1 = w1 * x + b1                   # (10, tile)

    # l2: 10x10 matmul as 10 statically-unrolled broadcast FMAs (VPU), no MXU.
    h2 = b2 + p[:, 2:3] * h1[0:1, :]
    for f in range(1, 10):
        h2 = h2 + p[:, 2 + f:3 + f] * h1[f:f + 1, :]       # (10, tile)

    # l3: weighted reduction over the 10 feature sublanes (XLU) + bias.
    h3 = jnp.sum(w3 * h2, axis=0, keepdims=True) + b3      # (1, tile)

    o_ref[...] = h3.astype(o_ref.dtype)


def pack_params(params):
    """Pack PyTorch-layout params (weight: (out,in), bias: (out,)) into one (10,16) slab."""
    P = jnp.zeros((_P_ROWS, _P_COLS), jnp.float32)
    P = P.at[:, 0].set(params["w1"][:, 0])
    P = P.at[:, 1].set(params["b1"])
    P = P.at[:, 2:12].set(params["w2"])
    P = P.at[:, 12].set(params["b2"])
    P = P.at[:, 13].set(params["w3"][0, :])
    P = P.at[0, 14].set(params["b3"][0])
    return P


def net2_forward(x, params, *, tile=2048):
    """x: (N, 1) float32. params: PyTorch-layout weights/biases. Returns (N, 1) float32."""
    N = x.shape[0]
    assert x.shape == (N, 1)
    assert tile % 128 == 0, "tile must be lane-aligned (multiple of 128)"

    p_slab = pack_params(params)

    # Lane-dense: put the batch on the 128-lane axis.
    x_lanes = x.astype(jnp.float32).reshape(1, N)

    # Pad the batch to a lane-aligned tile multiple; small batches run in one grid step.
    n_pad = int(pl.cdiv(N, 128)) * 128
    if n_pad <= tile:
        tile = n_pad                       # whole (padded) batch in one invocation
    else:
        n_pad = int(pl.cdiv(N, tile)) * tile
    if n_pad != N:
        x_lanes = jnp.pad(x_lanes, ((0, 0), (0, n_pad - N)))

    out = pl.pallas_call(
        net2_kernel,
        out_shape=jax.ShapeDtypeStruct((1, n_pad), jnp.float32),
        grid_spec=pltpu.PrefetchScalarGridSpec(
            num_scalar_prefetch=0,
            grid=(n_pad // tile,),
            in_specs=[
                pl.BlockSpec((_P_ROWS, _P_COLS), lambda i: (0, 0)),  # packed params, replicated
                pl.BlockSpec((1, tile), lambda i: (0, i)),           # lane-dense batch tile
            ],
            out_specs=pl.BlockSpec((1, tile), lambda i: (0, i)),     # dense unmasked stores
        ),
        compiler_params=pltpu.CompilerParams(
            dimension_semantics=("parallel",),   # shards across TensorCores on v7x
        ),
    )(p_slab, x_lanes)

    return out[:, :N].reshape(N, 1)


def init_params(key):
    """PyTorch nn.Linear default init: U(-1/sqrt(fan_in), 1/sqrt(fan_in)); PyTorch layouts."""
    def uni(k, shape, fan_in):
        bound = 1.0 / (fan_in ** 0.5)
        return jax.random.uniform(k, shape, jnp.float32, -bound, bound)
    ks = jax.random.split(key, 6)
    return {
        "w1": uni(ks[0], (10, 1), 1.0),   "b1": uni(ks[1], (10,), 1.0),
        "w2": uni(ks[2], (10, 10), 10.0), "b2": uni(ks[3], (10,), 10.0),
        "w3": uni(ks[4], (1, 10), 10.0),  "b3": uni(ks[5], (1,), 10.0),
    }


def net2_ref(x, params):
    """Pure-JAX reference matching the PyTorch forward exactly."""
    h1 = x @ params["w1"].T + params["b1"]
    h2 = h1 @ params["w2"].T + params["b2"]
    return h2 @ params["w3"].T + params["b3"]


if __name__ == "__main__":
    key = jax.random.PRNGKey(0)
    pkey, xkey = jax.random.split(key)
    params = init_params(pkey)

    N = 100  # matches the spec's x = np.random.randn(100, 1)
    x = jax.random.normal(xkey, (N, 1), jnp.float32)

    out = jax.block_until_ready(net2_forward(x, params))

    ref = net2_ref(x, params)
    assert out.shape == (N, 1)
    assert jnp.allclose(out, ref, atol=1e-5, rtol=1e-5), "mismatch vs reference"

    print("KERNEL_OK")
</pallas_src>

<mosaic_0001>
module attributes {stable_mosaic.version = 11 : i64} {
  func.func @net2_kernel(%arg0: i32, %arg1: memref<10x16xf32, #tpu.memory_space<vmem>>, %arg2: memref<1x128xf32, #tpu.memory_space<vmem>>, %arg3: memref<1x128xf32, #tpu.memory_space<vmem>>) attributes {dimension_semantics = [#tpu.dimension_semantics<parallel>], iteration_bounds = array<i64: 1>, scalar_prefetch = 0 : i64, scratch_operands = 0 : i64, tpu.core_type = #tpu.core_type<tc>, window_params = [{pipeline_mode = #tpu.pipeline_mode<synchronous>, transform_indices = @transform_0, window_bounds = array<i64: 10, 16>}, {transform_indices = @transform_1, window_bounds = array<i64: 1, 128>}, {transform_indices = @transform_2, window_bounds = array<i64: 1, 128>}]} {
    %c0 = arith.constant 0 : index
    %c0_0 = arith.constant 0 : index
    %0 = vector.load %arg1[%c0, %c0_0] : memref<10x16xf32, #tpu.memory_space<vmem>>, vector<10x16xf32>
    %c0_1 = arith.constant 0 : index
    %c0_2 = arith.constant 0 : index
    %1 = vector.load %arg2[%c0_1, %c0_2] : memref<1x128xf32, #tpu.memory_space<vmem>>, vector<1x128xf32>
    %2 = vector.extract_strided_slice %0 {offsets = [0, 0], sizes = [10, 1], strides = [1, 1]} : vector<10x16xf32> to vector<10x1xf32>
    %3 = vector.extract_strided_slice %0 {offsets = [0, 1], sizes = [10, 1], strides = [1, 1]} : vector<10x16xf32> to vector<10x1xf32>
    %4 = vector.extract_strided_slice %0 {offsets = [0, 12], sizes = [10, 1], strides = [1, 1]} : vector<10x16xf32> to vector<10x1xf32>
    %5 = vector.extract_strided_slice %0 {offsets = [0, 13], sizes = [10, 1], strides = [1, 1]} : vector<10x16xf32> to vector<10x1xf32>
    %6 = vector.extract_strided_slice %0 {offsets = [0, 14], sizes = [1, 1], strides = [1, 1]} : vector<10x16xf32> to vector<1x1xf32>
    %7 = vector.broadcast %2 : vector<10x1xf32> to vector<10x128xf32>
    %8 = vector.broadcast %1 : vector<1x128xf32> to vector<10x128xf32>
    %9 = arith.mulf %7, %8 : vector<10x128xf32>
    %10 = vector.broadcast %3 : vector<10x1xf32> to vector<10x128xf32>
    %11 = arith.addf %9, %10 : vector<10x128xf32>
    %12 = vector.extract_strided_slice %0 {offsets = [0, 2], sizes = [10, 1], strides = [1, 1]} : vector<10x16xf32> to vector<10x1xf32>
    %13 = vector.extract_strided_slice %11 {offsets = [0, 0], sizes = [1, 128], strides = [1, 1]} : vector<10x128xf32> to vector<1x128xf32>
    %14 = vector.broadcast %12 : vector<10x1xf32> to vector<10x128xf32>
    %15 = vector.broadcast %13 : vector<1x128xf32> to vector<10x128xf32>
    %16 = arith.mulf %14, %15 : vector<10x128xf32>
    %17 = vector.broadcast %4 : vector<10x1xf32> to vector<10x128xf32>
    %18 = arith.addf %17, %16 : vector<10x128xf32>
    %19 = vector.extract_strided_slice %0 {offsets = [0, 3], sizes = [10, 1], strides = [1, 1]} : vector<10x16xf32> to vector<10x1xf32>
    %20 = vector.extract_strided_slice %11 {offsets = [1, 0], sizes = [1, 128], strides = [1, 1]} : vector<10x128xf32> to vector<1x128xf32>
    %21 = vector.broadcast %19 : vector<10x1xf32> to vector<10x128xf32>
    %22 = vector.broadcast %20 : vector<1x128xf32> to vector<10x128xf32>
    %23 = arith.mulf %21, %22 : vector<10x128xf32>
    %24 = arith.addf %18, %23 : vector<10x128xf32>
    %25 = vector.extract_strided_slice %0 {offsets = [0, 4], sizes = [10, 1], strides = [1, 1]} : vector<10x16xf32> to vector<10x1xf32>
    %26 = vector.extract_strided_slice %11 {offsets = [2, 0], sizes = [1, 128], strides = [1, 1]} : vector<10x128xf32> to vector<1x128xf32>
    %27 = vector.broadcast %25 : vector<10x1xf32> to vector<10x128xf32>
    %28 = vector.broadcast %26 : vector<1x128xf32> to vector<10x128xf32>
    %29 = arith.mulf %27, %28 : vector<10x128xf32>
    %30 = arith.addf %24, %29 : vector<10x128xf32>
    %31 = vector.extract_strided_slice %0 {offsets = [0, 5], sizes = [10, 1], strides = [1, 1]} : vector<10x16xf32> to vector<10x1xf32>
    %32 = vector.extract_strided_slice %11 {offsets = [3, 0], sizes = [1, 128], strides = [1, 1]} : vector<10x128xf32> to vector<1x128xf32>
    %33 = vector.broadcast %31 : vector<10x1xf32> to vector<10x128xf32>
    %34 = vector.broadcast %32 : vector<1x128xf32> to vector<10x128xf32>
    %35 = arith.mulf %33, %34 : vector<10x128xf32>
    %36 = arith.addf %30, %35 : vector<10x128xf32>
    %37 = vector.extract_strided_slice %0 {offsets = [0, 6], sizes = [10, 1], strides = [1, 1]} : vector<10x16xf32> to vector<10x1xf32>
    %38 = vector.extract_strided_slice %11 {offsets = [4, 0], sizes = [1, 128], strides = [1, 1]} : vector<10x128xf32> to vector<1x128xf32>
    %39 = vector.broadcast %37 : vector<10x1xf32> to vector<10x128xf32>
    %40 = vector.broadcast %38 : vector<1x128xf32> to vector<10x128xf32>
    %41 = arith.mulf %39, %40 : vector<10x128xf32>
    %42 = arith.addf %36, %41 : vector<10x128xf32>
    %43 = vector.extract_strided_slice %0 {offsets = [0, 7], sizes = [10, 1], strides = [1, 1]} : vector<10x16xf32> to vector<10x1xf32>
    %44 = vector.extract_strided_slice %11 {offsets = [5, 0], sizes = [1, 128], strides = [1, 1]} : vector<10x128xf32> to vector<1x128xf32>
    %45 = vector.broadcast %43 : vector<10x1xf32> to vector<10x128xf32>
    %46 = vector.broadcast %44 : vector<1x128xf32> to vector<10x128xf32>
    %47 = arith.mulf %45, %46 : vector<10x128xf32>
    %48 = arith.addf %42, %47 : vector<10x128xf32>
    %49 = vector.extract_strided_slice %0 {offsets = [0, 8], sizes = [10, 1], strides = [1, 1]} : vector<10x16xf32> to vector<10x1xf32>
    %50 = vector.extract_strided_slice %11 {offsets = [6, 0], sizes = [1, 128], strides = [1, 1]} : vector<10x128xf32> to vector<1x128xf32>
    %51 = vector.broadcast %49 : vector<10x1xf32> to vector<10x128xf32>
    %52 = vector.broadcast %50 : vector<1x128xf32> to vector<10x128xf32>
    %53 = arith.mulf %51, %52 : vector<10x128xf32>
    %54 = arith.addf %48, %53 : vector<10x128xf32>
    %55 = vector.extract_strided_slice %0 {offsets = [0, 9], sizes = [10, 1], strides = [1, 1]} : vector<10x16xf32> to vector<10x1xf32>
    %56 = vector.extract_strided_slice %11 {offsets = [7, 0], sizes = [1, 128], strides = [1, 1]} : vector<10x128xf32> to vector<1x128xf32>
    %57 = vector.broadcast %55 : vector<10x1xf32> to vector<10x128xf32>
    %58 = vector.broadcast %56 : vector<1x128xf32> to vector<10x128xf32>
    %59 = arith.mulf %57, %58 : vector<10x128xf32>
    %60 = arith.addf %54, %59 : vector<10x128xf32>
    %61 = vector.extract_strided_slice %0 {offsets = [0, 10], sizes = [10, 1], strides = [1, 1]} : vector<10x16xf32> to vector<10x1xf32>
    %62 = vector.extract_strided_slice %11 {offsets = [8, 0], sizes = [1, 128], strides = [1, 1]} : vector<10x128xf32> to vector<1x128xf32>
    %63 = vector.broadcast %61 : vector<10x1xf32> to vector<10x128xf32>
    %64 = vector.broadcast %62 : vector<1x128xf32> to vector<10x128xf32>
    %65 = arith.mulf %63, %64 : vector<10x128xf32>
    %66 = arith.addf %60, %65 : vector<10x128xf32>
    %67 = vector.extract_strided_slice %0 {offsets = [0, 11], sizes = [10, 1], strides = [1, 1]} : vector<10x16xf32> to vector<10x1xf32>
    %68 = vector.extract_strided_slice %11 {offsets = [9, 0], sizes = [1, 128], strides = [1, 1]} : vector<10x128xf32> to vector<1x128xf32>
    %69 = vector.broadcast %67 : vector<10x1xf32> to vector<10x128xf32>
    %70 = vector.broadcast %68 : vector<1x128xf32> to vector<10x128xf32>
    %71 = arith.mulf %69, %70 : vector<10x128xf32>
    %72 = arith.addf %66, %71 : vector<10x128xf32>
    %73 = vector.broadcast %5 : vector<10x1xf32> to vector<10x128xf32>
    %74 = arith.mulf %73, %72 : vector<10x128xf32>
    %cst = arith.constant dense<0.000000e+00> : vector<128xf32>
    %75 = vector.multi_reduction <add>, %74, %cst [0] : vector<10x128xf32> to vector<128xf32>
    %76 = vector.shape_cast %75 : vector<128xf32> to vector<1x128xf32>
    %77 = vector.broadcast %6 : vector<1x1xf32> to vector<1x128xf32>
    %78 = arith.addf %76, %77 : vector<1x128xf32>
    %c0_3 = arith.constant 0 : index
    %c0_4 = arith.constant 0 : index
    %79 = vector.load %arg3[%c0_3, %c0_4] : memref<1x128xf32, #tpu.memory_space<vmem>>, vector<1x128xf32>
    tpu.vector_store %arg3[%c0_3, %c0_4], %78 {strides = array<i32>} : memref<1x128xf32, #tpu.memory_space<vmem>>, vector<1x128xf32>,
    return
  }
  func.func @transform_0(%arg0: i32) -> (i32, i32) {
    %c0_i32 = arith.constant 0 : i32
    %c0_i32_0 = arith.constant 0 : i32
    %c0_i32_1 = arith.constant 0 : i32
    return %c0_i32, %c0_i32_0 : i32, i32
  }
  func.func @transform_1(%arg0: i32) -> (i32, i32) {
    %c0_i32 = arith.constant 0 : i32
    %c0_i32_0 = arith.constant 0 : i32
    return %c0_i32, %arg0 : i32, i32
  }
  func.func @transform_2(%arg0: i32) -> (i32, i32) {
    %c0_i32 = arith.constant 0 : i32
    %c0_i32_0 = arith.constant 0 : i32
    return %c0_i32, %arg0 : i32, i32
  }
}

</mosaic_0001>

<bundles_post_ra>
// kernel: tpu_custom_call.1
= control target key start
LH: loop header
LB: loop body
LE: loop exit
PB: predicated region body
PF: predicated region fallthrough
CT: control target
= control target key end

     0   :  { %7 = vsyncpa [#allocation3], 0  ;;  %s445_s0 = inlined_call_operand.hbm [shape: f32[10,16], index: 0, kind: input, shape index: {}]   ;;  %s446_s1 = inlined_call_operand.vmem [shape: f32[1,128], index: 1, kind: input, shape index: {}]   ;;  %s447_s2 = inlined_call_operand.hbm [shape: f32[1,128], index: 2, kind: output, shape index: {}]  }
   0x1   :  { %8 = vsyncpa [#allocation4], 0  ;;  %s357_s9 = smov [#allocation2]   ;;  %s309_s13 = scalar_lea.hbm %s445_s0, 256 }
   0x2   :  { %s14_s10 = sshll.u32 %s357_s9, 4  ;;  %p310_p0 = scmp.ne.s32.totalorder %s445_s0, %s309_s13  ;;  %s15_s10 = int_to_ptr.vmem [resolvable:$true] %s14_s10 }
   0x3   :  { %p313_p1 = scmp.lt.u32.totalorder %s309_s13, %s445_s0 }
   0x5   :  { %p315_p2 = pnand %p313_p1, %p310_p0 }
   0x7   :  { %318 = shalt.err (!%p315_p2)
}
   0x8   :  { %s319_s18 = scalar_lea.vmem %s15_s10, 256  ;;  %p324_p4 = scmp.lt.s32.totalorder %s15_s10, %s15_s10 }
   0x9   :  { %p320_p3 = scmp.ne.s32.totalorder %s15_s10, %s319_s18  ;;  %p325_p5 = scmp.lt.s32.totalorder %s319_s18, %s319_s18 }
   0xb   :  { %p326_p6 = por %p325_p5, %p324_p4 }
   0xd   :  { %p327_p7 = pnand %p326_p6, %p320_p3 }
   0xf   :  { %330 = shalt.err (!%p327_p7)
}
  0x10   :  { %s358_s19 = smov 128   ;;  %s359_s20 = smov 8  }
  0x11   :  { %20 = dma.hbm_to_vmem [thread:$0]  %s445_s0, 256, %s15_s10, [#allocation3], %s358_s19, %s358_s19, %s359_s20  }
  0x12   :  { %353 = dma.done.wait [#allocation3], 256  }
  0x13   :  { %354 = vsyncadd [#allocation3], 4294967040  ;;  %v360_v0 = vmov 1   ;;  %v361_v1 = vmov 0   ;;  %v403_v2 = vld [vmem:[#allocation2] sm:$0xff]  ;;  %v362_v4 = vmov 2   ;;  %v65_v27 = vlaneseq }
  0x14   :  { %286 = vset.pattern.permute.xlu1 %v360_v0  ;;  %285 = vset.pattern.permute.xlu0 %v361_v1  ;;  %v27_v3 = vld [vmem:[#allocation2 + $0x8] sm:$0x3]  ;;  %v363_v5 = vmov 12   ;;  %v364_v6 = vmov 3   ;;  %v365_v7 = vmov 4   ;;  %v366_v8 = vmov 6  }
  0x15   :  { %48 = vperm.xlu1 %286, %v403_v2   ;;  %31 = vperm.xlu0 %285, %v403_v2   ;;  %v367_v9 = vmov 5   ;;  %v368_v10 = vmov 7   ;;  %v369_v11 = vmov 8   ;;  %v370_v12 = vmov 10   ;;  %v265_v29 = vld [vmem:[%s446_s1] ss:$0 sm:$0xff] }
  0x16   :  { %v371_v13 = vmov 11   ;;  %v372_v14 = vmov 14   ;;  %v373_v15 = vmov 9   ;;  %v374_v16 = vmov 13   ;;  %s375_s1 = smov [#allocation5]  }
  0x17   :  { %v423_v32 = vshrl.u32 %v65_v27, 7  ;;  %vm235_vm0 = vcmask 1041408   ;;  %s256_s24 = sshll.u32 %s375_s1, 4  ;;  %s257_s24 = int_to_ptr.vmem [resolvable:$true] %s256_s24 }
  0x18   :  { %s331_s25 = scalar_lea.vmem %s257_s24, 16  ;;  %s335_s26 = scalar_lea.vmem %s257_s24, 32 }
  0x19   :  { %287 = vset.pattern.permute.xlu1 %v362_v4  ;;  %36 = vperm.xlu0 %285, %v27_v3   ;;  %v67_v35 = vsub.s32 0, %v423_v32  ;;  %v91_v37 = vsub.s32 1, %v423_v32  ;;  %v107_v39 = vsub.s32 2, %v423_v32  ;;  %v123_v43 = vsub.s32 3, %v423_v32  ;;  %p332_p8 = scmp.ne.s32.totalorder %s257_s24, %s331_s25  ;;  %p336_p9 = scmp.lt.s32.totalorder %s257_s24, %s257_s24 }
  0x1a   :  { %62 = vperm.xlu1 %287, %v27_v3   ;;  %v139_v55 = vsub.s32 4, %v423_v32  ;;  %v155_v58 = vsub.s32 5, %v423_v32  ;;  %v171_v61 = vsub.s32 6, %v423_v32  ;;  %p337_p10 = scmp.lt.s32.totalorder %s335_s26, %s331_s25 }
  0x1c   :  { %p338_p11 = por %p337_p10, %p336_p9 }
  0x1d   :  { %288 = vset.pattern.permute.xlu0 %v362_v4 }
  0x1e   :  { %289 = vset.pattern.permute.xlu1 %v363_v5  ;;  %58 = vperm.xlu0 %288, %v403_v2   ;;  %p339_p12 = pnand %p338_p11, %p332_p8 }
  0x1f   :  { %76 = vperm.xlu1 %289, %v27_v3  }
  0x22   :  { %291 = vset.pattern.permute.xlu0 %v363_v5  ;;  %v187_v5 = vsub.s32 7, %v423_v32 }
  0x23   :  { %290 = vset.pattern.permute.xlu1 %v364_v6  ;;  %72 = vperm.xlu0 %291, %v403_v2  }
  0x24   :  { %86 = vperm.xlu1 %290, %v27_v3  }
  0x27   :  { %293 = vset.pattern.permute.xlu0 %v365_v7 }
  0x28   :  { %82 = vperm.xlu1 %290, %v403_v2   ;;  %98 = vperm.xlu0 %293, %v403_v2  }
  0x2c   :  { %292 = vset.pattern.permute.xlu1 %v365_v7  ;;  %295 = vset.pattern.permute.xlu0 %v366_v8 }
  0x2d   :  { %102 = vperm.xlu1 %292, %v27_v3   ;;  %134 = vperm.xlu0 %295, %v27_v3  }
  0x31   :  { %294 = vset.pattern.permute.xlu1 %v367_v9  ;;  %298 = vset.pattern.permute.xlu0 %v368_v10 }
  0x32   :  { %118 = vperm.xlu1 %294, %v27_v3   ;;  %146 = vperm.xlu0 %298, %v403_v2  }
  0x36   :  { %114 = vperm.xlu1 %294, %v403_v2   ;;  %301 = vset.pattern.permute.xlu0 %v369_v11 }
  0x37   :  { %162 = vperm.xlu0 %301, %v403_v2  }
  0x3a   :  { %296 = vset.pattern.permute.xlu1 %v366_v8 }
  0x3b   :  { %130 = vperm.xlu1 %296, %v403_v2   ;;  %303 = vset.pattern.permute.xlu0 %v370_v12 }
  0x3c   :  { %198 = vperm.xlu0 %303, %v27_v3  }
  0x3f   :  { %297 = vset.pattern.permute.xlu1 %v368_v10 }
  0x40   :  { %150 = vperm.xlu1 %297, %v27_v3   ;;  %306 = vset.pattern.permute.xlu0 %v371_v13 }
  0x41   :  { %210 = vperm.xlu0 %306, %v403_v2  }
  0x44   :  { %299 = vset.pattern.permute.xlu1 %v360_v0 }
  0x45   :  { %52 = vperm.xlu1 %299, %v27_v3   ;;  %308 = vset.pattern.permute.xlu0 %v372_v14 }
  0x46   :  { %245 = vperm.xlu0 %308, %v403_v2  }
  0x49   :  { %300 = vset.pattern.permute.xlu1 %v369_v11 }
  0x4a   :  { %166 = vperm.xlu1 %300, %v27_v3  }
  0x4e   :  { %302 = vset.pattern.permute.xlu1 %v373_v15 }
  0x4f   :  { %182 = vperm.xlu1 %302, %v27_v3  }
  0x53   :  { %178 = vperm.xlu1 %302, %v403_v2  }
  0x57   :  { %304 = vset.pattern.permute.xlu1 %v370_v12 }
  0x58   :  { %194 = vperm.xlu1 %304, %v403_v2  }
  0x5c   :  { %305 = vset.pattern.permute.xlu1 %v371_v13 }
  0x5d   :  { %214 = vperm.xlu1 %305, %v27_v3  }
  0x61   :  { %307 = vset.pattern.permute.xlu1 %v374_v16 }
  0x62   :  { %230 = vperm.xlu1 %307, %v27_v3  }
  0x66   :  { %226 = vperm.xlu1 %307, %v403_v2  }
  0x94   :  { %v49_v17 = vpop.permute.xlu1 %48  ;;  %v32_v22 = vpop.permute.xlu0 %31 }
  0x95   :  { %v45_v31 = vmul.f32 %v265_v29, %v32_v22 }
  0x97   :  { %v55_v34 = vadd.f32 %v49_v17, %v45_v31 }
  0x98   :  { %v37_v24 = vpop.permute.xlu0 %36 }
  0x99   :  { %v63_v18 = vpop.permute.xlu1 %62  ;;  %v68_v38 = vrot.slane %v55_v34, %v67_v35  ;;  %v92_v42 = vrot.slane %v55_v34, %v91_v37  ;;  %v108_v46 = vrot.slane %v55_v34, %v107_v39  ;;  %v124_v52 = vrot.slane %v55_v34, %v123_v43 }
  0x9a   :  { %v140_v63 = vrot.slane %v55_v34, %v139_v55  ;;  %v156_v3 = vrot.slane %v55_v34, %v155_v58  ;;  %v46_v8 = vmul.f32 %v265_v29, %v37_v24  ;;  %v172_v10 = vrot.slane %v55_v34, %v171_v61 }
  0x9b   :  { %v70_v44 = vmul.f32 %v68_v38, %v63_v18  ;;  %v188_v17 = vrot.slane %v55_v34, %v187_v5 }
  0x9d   :  { %v59_v28 = vpop.permute.xlu0 %58 }
  0x9e   :  { %v77_v19 = vpop.permute.xlu1 %76  ;;  %v69_v47 = vmul.f32 %v68_v38, %v59_v28 }
  0x9f   :  { %v80_v49 = vadd.f32 %v77_v19, %v70_v44 }
  0xa2   :  { %v73_v33 = vpop.permute.xlu0 %72 }
  0xa3   :  { %v87_v20 = vpop.permute.xlu1 %86  ;;  %v79_v54 = vadd.f32 %v73_v33, %v69_v47 }
  0xa4   :  { %v94_v45 = vmul.f32 %v92_v42, %v87_v20 }
  0xa6   :  { %v96_v56 = vadd.f32 %v94_v45, %v80_v49 }
  0xa7   :  { %v83_v21 = vpop.permute.xlu1 %82  ;;  %v99_v40 = vpop.permute.xlu0 %98 }
  0xa8   :  { %v93_v48 = vmul.f32 %v92_v42, %v83_v21  ;;  %v109_v62 = vmul.f32 %v108_v46, %v99_v40 }
  0xaa   :  { %v95_v59 = vadd.f32 %v93_v48, %v79_v54 }
  0xac   :  { %v103_v23 = vpop.permute.xlu1 %102  ;;  %v135_v51 = vpop.permute.xlu0 %134  ;;  %v111_v6 = vadd.f32 %v109_v62, %v95_v59 }
  0xad   :  { %v110_v50 = vmul.f32 %v108_v46, %v103_v23  ;;  %v142_v9 = vmul.f32 %v140_v63, %v135_v51 }
  0xaf   :  { %v112_v60 = vadd.f32 %v110_v50, %v96_v56 }
  0xb1   :  { %v119_v25 = vpop.permute.xlu1 %118  ;;  %v147_v4 = vpop.permute.xlu0 %146 }
  0xb2   :  { %v126_v57 = vmul.f32 %v124_v52, %v119_v25  ;;  %v157_v22 = vmul.f32 %v156_v3, %v147_v4 }
  0xb4   :  { %v128_v2 = vadd.f32 %v126_v57, %v112_v60 }
  0xb5   :  { %v115_v26 = vpop.permute.xlu1 %114 }
  0xb6   :  { %v125_v0 = vmul.f32 %v124_v52, %v115_v26  ;;  %v144_v14 = vadd.f32 %v142_v9, %v128_v2  ;;  %v163_v19 = vpop.permute.xlu0 %162 }
  0xb7   :  { %v173_v29 = vmul.f32 %v172_v10, %v163_v19 }
  0xb8   :  { %v127_v12 = vadd.f32 %v125_v0, %v111_v6 }
  0xba   :  { %v131_v30 = vpop.permute.xlu1 %130 }
  0xbb   :  { %v141_v7 = vmul.f32 %v140_v63, %v131_v30  ;;  %v199_v28 = vpop.permute.xlu0 %198 }
  0xbd   :  { %v143_v18 = vadd.f32 %v141_v7, %v127_v12 }
  0xbf   :  { %v151_v36 = vpop.permute.xlu1 %150  ;;  %v159_v27 = vadd.f32 %v157_v22, %v143_v18 }
  0xc0   :  { %v158_v11 = vmul.f32 %v156_v3, %v151_v36 }
  0xc1   :  { %v175_v33 = vadd.f32 %v173_v29, %v159_v27 }
  0xc2   :  { %v160_v20 = vadd.f32 %v158_v11, %v144_v14 }
  0xc4   :  { %v53_v41 = vpop.permute.xlu1 %52 }
  0xc5   :  { %v56_v15 = vadd.f32 %v53_v41, %v46_v8  ;;  %v211_v41 = vpop.permute.xlu0 %210 }
  0xc7   :  { %v204_v23 = vrot.slane %v56_v15, %v67_v35  ;;  %v220_v32 = vrot.slane %v56_v15, %v91_v37 }
  0xc9   :  { %v167_v53 = vpop.permute.xlu1 %166  ;;  %v206_v31 = vmul.f32 %v204_v23, %v199_v28  ;;  %v221_v35 = vmul.f32 %v220_v32, %v211_v41  ;;  %v246_v55 = vpop.permute.xlu0 %245 }
  0xca   :  { %v174_v16 = vmul.f32 %v172_v10, %v167_v53 }
  0xcc   :  { %v176_v25 = vadd.f32 %v174_v16, %v160_v20 }
  0xce   :  { %v183_v1 = vpop.permute.xlu1 %182 }
  0xcf   :  { %v190_v21 = vmul.f32 %v188_v17, %v183_v1 }
  0xd1   :  { %v192_v24 = vadd.f32 %v190_v21, %v176_v25 }
  0xd2   :  { %v179_v13 = vpop.permute.xlu1 %178 }
  0xd3   :  { %v189_v30 = vmul.f32 %v188_v17, %v179_v13  ;;  %v208_v34 = vadd.f32 %v206_v31, %v192_v24 }
  0xd5   :  { %v191_v40 = vadd.f32 %v189_v30, %v175_v33 }
  0xd7   :  { %v195_v26 = vpop.permute.xlu1 %194 }
  0xd8   :  { %v205_v36 = vmul.f32 %v204_v23, %v195_v26 }
  0xda   :  { %v207_v43 = vadd.f32 %v205_v36, %v191_v40 }
  0xdc   :  { %v215_v38 = vpop.permute.xlu1 %214  ;;  %v223_v46 = vadd.f32 %v221_v35, %v207_v43 }
  0xdd   :  { %v222_v39 = vmul.f32 %v220_v32, %v215_v38 }
  0xdf   :  { %v224_v42 = vadd.f32 %v222_v39, %v208_v34 }
  0xe1   :  { %v231_v44 = vpop.permute.xlu1 %230 }
  0xe2   :  { %v234_v45 = vmul.f32 %v231_v44, %v224_v42 }
  0xe4   :  { %v236_v49 = vsel %vm235_vm0, %v234_v45, 0.0 }
  0xe5   :  { %v227_v47 = vpop.permute.xlu1 %226 }
  0xe6   :  { %v233_v48 = vmul.f32 %v227_v47, %v223_v46 }
  0xe8   :  { %v237_v50 = vadd.f32 %v236_v49, %v233_v48 }
  0xea   :  { %v238_v51 = vrot.slane %v237_v50, 4 }
  0xec   :  { %v239_v37 = vadd.f32 %v238_v51, %v237_v50 }
  0xee   :  { %v240_v52 = vrot.slane %v239_v37, 2 }
  0xf0   :  { %v241_v53 = vadd.f32 %v240_v52, %v239_v37 }
  0xf2   :  { %v242_v54 = vrot.slane %v241_v53, 1 }
  0xf4   :  { %v243_v56 = vadd.f32 %v242_v54, %v241_v53 }
  0xf6   :  { %v248_v57 = vadd.f32 %v246_v55, %v243_v56 }
  0xf8   :  { %249 = vst [vmem:[#allocation5] sm:$0x1] %v248_v57 }
  0xf9   :  { %342 = shalt.err (!%p339_p12)
}
  0xfa   :  { %s343_s29 = scalar_lea.hbm %s447_s2, 16 }
  0xfb   :  { %p344_p13 = scmp.ne.s32.totalorder %s447_s2, %s343_s29  ;;  %p347_p0 = scmp.lt.u32.totalorder %s343_s29, %s447_s2 }
  0xfd   :  { %p349_p1 = pnand %p347_p0, %p344_p13 }
  0xff   :  { %352 = shalt.err (!%p349_p1)
}
 0x100   :  { %259 = dma.vmem_to_hbm [thread:$0]  %s257_s24, 16, %s447_s2, [#allocation4]  }
 0x101   :  { %355 = dma.done.wait [#allocation4], 16  }
 0x102   :  { %356 = vsyncadd [#allocation4], 4294967280 }
 0x103   :  { %263 = vsyncpa [#allocation3], 1 }
 0x104   :  { %264 = vsyncpa [#allocation4], 1 }

</bundles_post_ra>
